<compile_context>
chip_gen: v6e
topology: v6e:2x2x1
jax: 0.10.0
libtpu: 0.0.40
codegen_flags: <defaults>
</compile_context>

<pallas_src>
import functools

import jax
import jax.numpy as jnp
from jax.experimental import pallas as pl
from jax.experimental.pallas import tpu as pltpu


# ----------------------------------------------------------------------------
# Phase 1: streaming spatial-mean (adaptive average pool) kernel.
# ----------------------------------------------------------------------------
def cam_pool_kernel(x_ref, pooled_ref, *, hw, thw, inv_hw):
    # x_ref     : (N, c_blk, thw) tile of the flattened (N, C, H*W) input
    # pooled_ref: (c_blk, N) f32 resident output block (accumulator)
    ki = pl.program_id(1)

    @pl.when(ki == 0)
    def _init():
        pooled_ref[...] = jnp.zeros_like(pooled_ref)

    x = x_ref[...]
    if hw % thw != 0:
        # Ragged final spatial tile: zero out-of-range columns before summing.
        rem = hw - ki * thw
        lane = jax.lax.broadcasted_iota(jnp.int32, x.shape, dimension=2)
        x = jnp.where(lane < rem, x, jnp.zeros_like(x))

    # Partial spatial sum (f32 accumulation), transposed into the (c_blk, N)
    # output block layout (keeps c_blk on the sublane-friendly axis so channel
    # blocks only need to be multiples of 8, not 128).
    pooled_ref[...] += jnp.sum(x, axis=-1, dtype=jnp.float32).T

    @pl.when(ki == pl.num_programs(1) - 1)
    def _finalize():
        pooled_ref[...] = pooled_ref[...] * inv_hw


# ----------------------------------------------------------------------------
# Phase 2: tiny MLP + softmax + global min/max epilogue (transposed layout).
# ----------------------------------------------------------------------------
def cam_epilogue_kernel(pooled_ref, w1_ref, b1_ref, w2_ref, b2_ref, o_ref):
    # pooled_ref: (C, N) f32 means
    # w1_ref    : (C4, C)  conv1 weight (native PyTorch layout)
    # b1_ref    : (C4, 1)
    # w2_ref    : (C, C4)  conv2 weight (native PyTorch layout)
    # b2_ref    : (C, 1)
    # o_ref     : (C, N)   channel attention (transposed; wrapper reshapes)
    pooled = pooled_ref[...]

    z1 = jnp.dot(w1_ref[...], pooled,
                 preferred_element_type=jnp.float32) + b1_ref[...]
    z1 = jnp.maximum(z1, 0.0)

    z2 = jnp.dot(w2_ref[...], z1,
                 preferred_element_type=jnp.float32) + b2_ref[...]

    # Softmax over the channel axis (axis 0 in this transposed layout).
    m = jnp.max(z2, axis=0, keepdims=True)
    e = jnp.exp(z2 - m)
    att = e / jnp.sum(e, axis=0, keepdims=True)

    # Global (whole-tensor) min-subtract, then divide by global max.
    att = att - jnp.min(att)
    att = att / jnp.max(att)

    o_ref[...] = att.astype(o_ref.dtype)


# ----------------------------------------------------------------------------
# Tiling / per-chip configuration.
# ----------------------------------------------------------------------------
def _chip_budgets():
    """(target_block_bytes, vmem_limit_bytes), derived per TPU generation."""
    try:
        vmem = int(getattr(pltpu.get_tpu_info(), "vmem_capacity_bytes", 0))
    except Exception:
        vmem = 0
    if vmem >= 96 * 1024 * 1024:
        # v5e / v6e class: 128 MiB physical VMEM -> big blocks, raised limit.
        return 16 * 1024 * 1024, 64 * 1024 * 1024
    # v7x class (64 MiB per TC) or unknown: spend VMEM on block size, depth 2.
    return 8 * 1024 * 1024, 32 * 1024 * 1024


def _choose_tiles(n, c, hw, itemsize, target_block_bytes):
    """Pick (c_blk, thw) for the (N, c_blk, thw) x block.

    c_blk must be a multiple of 8 (or == C) for the layout rules of both the
    input block and the (c_blk, N) pooled-output block.  Prefer full-HW blocks
    (longest contiguous DMA runs); otherwise tile HW in multiples of 128 with
    a cdiv grid + in-kernel mask on the ragged final tile.
    """
    if c % 8 == 0:
        c_candidates = [cb for cb in range(8, c + 1, 8) if c % cb == 0]
    else:
        c_candidates = [c]

    fitting = [cb for cb in c_candidates
               if n * cb * hw * itemsize <= target_block_bytes]
    if fitting:
        # Largest fitting block, but keep >= 2 channel blocks when possible so
        # the "parallel" grid axis can shard across v7x's two TensorCores.
        multi = [cb for cb in fitting if c // cb >= 2]
        c_blk = max(multi) if multi else max(fitting)
        return c_blk, hw

    # Full HW doesn't fit: smallest channel block, largest 128-multiple thw.
    # (If even the minimum 128-wide tile exceeds the budget we still use it —
    #  that is the smallest legal block.)
    c_blk = c_candidates[0]
    thw = (target_block_bytes // (n * c_blk * itemsize)) // 128 * 128
    thw = max(128, thw)
    thw = min(thw, pl.cdiv(hw, 128) * 128)
    if thw >= hw:
        return c_blk, hw
    return c_blk, thw


# ----------------------------------------------------------------------------
# Wrapper.
# ----------------------------------------------------------------------------
def cam_forward(x, w1, b1, w2, b2, *, target_block_bytes=None,
                vmem_limit_bytes=None):
    """x: (N, C, H, W).  w1: (C4, C), b1: (C4,), w2: (C, C4), b2: (C,)."""
    N, C, H, W = x.shape
    C4 = w1.shape[0]
    HW = H * W
    x_flat = x.reshape(N, C, HW)

    auto_blk, auto_vmem = _chip_budgets()
    if target_block_bytes is None:
        target_block_bytes = auto_blk
    if vmem_limit_bytes is None:
        vmem_limit_bytes = auto_vmem

    itemsize = jnp.dtype(x.dtype).itemsize
    c_blk, thw = _choose_tiles(N, C, HW, itemsize, target_block_bytes)
    grid = (C // c_blk, pl.cdiv(HW, thw))

    # Phase 1: pooled means, shape (C, N) f32.
    pooled = pl.pallas_call(
        functools.partial(cam_pool_kernel, hw=HW, thw=thw,
                          inv_hw=1.0 / float(HW)),
        out_shape=jax.ShapeDtypeStruct((C, N), jnp.float32),
        grid_spec=pltpu.PrefetchScalarGridSpec(
            num_scalar_prefetch=0,
            grid=grid,
            in_specs=[pl.BlockSpec((N, c_blk, thw),
                                   lambda ci, ki: (0, ci, ki))],
            out_specs=pl.BlockSpec((c_blk, N), lambda ci, ki: (ci, 0)),
        ),
        compiler_params=pltpu.CompilerParams(
            dimension_semantics=("parallel", "arbitrary"),
            vmem_limit_bytes=vmem_limit_bytes,
        ),
        cost_estimate=pl.CostEstimate(
            flops=N * C * HW,
            transcendentals=0,
            bytes_accessed=x_flat.size * itemsize + C * N * 4,
        ),
    )(x_flat)

    # Phase 2: tiny MLP + softmax + global min/max (everything fits in VMEM).
    att_t = pl.pallas_call(
        cam_epilogue_kernel,
        out_shape=jax.ShapeDtypeStruct((C, N), x.dtype),
    )(pooled, w1, b1.reshape(C4, 1), w2, b2.reshape(C, 1))

    return att_t.T.reshape(N, C, 1, 1)


def cam_reference(x, w1, b1, w2, b2):
    """Pure-JAX reference mirroring the PyTorch forward (for sanity check)."""
    pooled = jnp.mean(x.astype(jnp.float32), axis=(2, 3))   # (N, C)
    z1 = jnp.maximum(pooled @ w1.T + b1, 0.0)                # (N, C4)
    z2 = z1 @ w2.T + b2                                      # (N, C)
    att = jax.nn.softmax(z2, axis=1)
    att = att - jnp.min(att)
    att = att / jnp.max(att)
    return att.reshape(*att.shape, 1, 1).astype(x.dtype)


if __name__ == "__main__":
    key = jax.random.PRNGKey(0)
    kx, kw1, kb1, kw2, kb2, kx2 = jax.random.split(key, 6)

    N, C, H, W = 2, 16, 16, 16
    C4 = C // 4

    x = jax.random.normal(kx, (N, C, H, W), dtype=jnp.float32)
    # Conv2d(channel, channel//4, 1): weight (C4, C, 1, 1) -> squeeze to (C4, C)
    w1 = jax.random.normal(kw1, (C4, C), dtype=jnp.float32) * 0.1
    b1 = jax.random.normal(kb1, (C4,), dtype=jnp.float32) * 0.1
    # Conv2d(channel//4, channel, 1): weight (C, C4, 1, 1) -> squeeze to (C, C4)
    w2 = jax.random.normal(kw2, (C, C4), dtype=jnp.float32) * 0.1
    b2 = jax.random.normal(kb2, (C,), dtype=jnp.float32) * 0.1

    # 1) Chip-derived block budget: full-HW blocks, parallel channel axis.
    out = jax.block_until_ready(cam_forward(x, w1, b1, w2, b2))
    ref = cam_reference(x, w1, b1, w2, b2)
    assert out.shape == (N, C, 1, 1)
    assert jnp.allclose(out, ref, atol=1e-4, rtol=1e-4), "mismatch (case 1)"

    # 2) Ragged spatial size (15x15 -> HW=225) + tiny block budget: exercises
    #    the cdiv grid, the masked final spatial tile and the multi-step
    #    resident-accumulator path.
    H2 = W2 = 15
    x2 = jax.random.normal(kx2, (N, C, H2, W2), dtype=jnp.float32)
    out2 = jax.block_until_ready(
        cam_forward(x2, w1, b1, w2, b2, target_block_bytes=4 * 1024))
    ref2 = cam_reference(x2, w1, b1, w2, b2)
    assert out2.shape == (N, C, 1, 1)
    assert jnp.allclose(out2, ref2, atol=1e-4, rtol=1e-4), "mismatch (case 2)"

    print("KERNEL_OK")
</pallas_src>

<mosaic_0001>
module attributes {stable_mosaic.version = 11 : i64} {
  func.func @cam_pool_kernel(%arg0: i32, %arg1: i32, %arg2: memref<2x8x256xf32, #tpu.memory_space<vmem>>, %arg3: memref<8x2xf32, #tpu.memory_space<vmem>>) attributes {dimension_semantics = [#tpu.dimension_semantics<parallel>, #tpu.dimension_semantics<arbitrary>], iteration_bounds = array<i64: 2, 1>, scalar_prefetch = 0 : i64, scratch_operands = 0 : i64, tpu.core_type = #tpu.core_type<tc>, window_params = [{transform_indices = @transform_0, window_bounds = array<i64: 2, 8, 256>}, {transform_indices = @transform_1, window_bounds = array<i64: 8, 2>}]} {
    %c0_i32 = arith.constant 0 : i32
    %0 = arith.cmpi eq, %arg1, %c0_i32 : i32
    %1 = arith.extui %0 : i1 to i32
    %c0_i32_0 = arith.constant 0 : i32
    %2 = arith.cmpi ne, %1, %c0_i32_0 : i32
    scf.if %2 {
      %cst_9 = arith.constant 0.000000e+00 : f32
      %12 = vector.broadcast %cst_9 : f32 to vector<8x2xf32>
      %c0_10 = arith.constant 0 : index
      %c0_11 = arith.constant 0 : index
      %13 = vector.load %arg3[%c0_10, %c0_11] : memref<8x2xf32, #tpu.memory_space<vmem>>, vector<8x2xf32>
      tpu.vector_store %arg3[%c0_10, %c0_11], %12 {strides = array<i32>} : memref<8x2xf32, #tpu.memory_space<vmem>>, vector<8x2xf32>,
    } else {
    }
    %c0 = arith.constant 0 : index
    %c0_1 = arith.constant 0 : index
    %c0_2 = arith.constant 0 : index
    %3 = vector.load %arg2[%c0, %c0_1, %c0_2] : memref<2x8x256xf32, #tpu.memory_space<vmem>>, vector<2x8x256xf32>
    %c0_3 = arith.constant 0 : index
    %c0_4 = arith.constant 0 : index
    %4 = vector.load %arg3[%c0_3, %c0_4] : memref<8x2xf32, #tpu.memory_space<vmem>>, vector<8x2xf32>
    %cst = arith.constant dense<0.000000e+00> : vector<2x8xf32>
    %5 = vector.multi_reduction <add>, %3, %cst [2] : vector<2x8x256xf32> to vector<2x8xf32>
    %6 = tpu.transpose %5, [1, 0] : vector<2x8xf32> -> vector<8x2xf32>
    %7 = arith.addf %4, %6 : vector<8x2xf32>
    %c0_5 = arith.constant 0 : index
    %c0_6 = arith.constant 0 : index
    %8 = vector.load %arg3[%c0_5, %c0_6] : memref<8x2xf32, #tpu.memory_space<vmem>>, vector<8x2xf32>
    tpu.vector_store %arg3[%c0_5, %c0_6], %7 {strides = array<i32>} : memref<8x2xf32, #tpu.memory_space<vmem>>, vector<8x2xf32>,
    %c0_i32_7 = arith.constant 0 : i32
    %9 = arith.cmpi eq, %arg1, %c0_i32_7 : i32
    %10 = arith.extui %9 : i1 to i32
    %c0_i32_8 = arith.constant 0 : i32
    %11 = arith.cmpi ne, %10, %c0_i32_8 : i32
    scf.if %11 {
      %c0_9 = arith.constant 0 : index
      %c0_10 = arith.constant 0 : index
      %12 = vector.load %arg3[%c0_9, %c0_10] : memref<8x2xf32, #tpu.memory_space<vmem>>, vector<8x2xf32>
      %cst_11 = arith.constant 3.906250e-03 : f32
      %13 = vector.broadcast %cst_11 : f32 to vector<8x2xf32>
      %14 = arith.mulf %12, %13 : vector<8x2xf32>
      %c0_12 = arith.constant 0 : index
      %c0_13 = arith.constant 0 : index
      %15 = vector.load %arg3[%c0_12, %c0_13] : memref<8x2xf32, #tpu.memory_space<vmem>>, vector<8x2xf32>
      tpu.vector_store %arg3[%c0_12, %c0_13], %14 {strides = array<i32>} : memref<8x2xf32, #tpu.memory_space<vmem>>, vector<8x2xf32>,
    } else {
    }
    return
  }
  func.func @transform_0(%arg0: i32, %arg1: i32) -> (i32, i32, i32) {
    %c0_i32 = arith.constant 0 : i32
    %c0_i32_0 = arith.constant 0 : i32
    return %c0_i32, %arg0, %arg1 : i32, i32, i32
  }
  func.func @transform_1(%arg0: i32, %arg1: i32) -> (i32, i32) {
    %c0_i32 = arith.constant 0 : i32
    %c0_i32_0 = arith.constant 0 : i32
    return %arg0, %c0_i32 : i32, i32
  }
}

</mosaic_0001>

<bundles_post_ra>
// kernel: tpu_custom_call.1
= control target key start
LH: loop header
LB: loop body
LE: loop exit
PB: predicated region body
PF: predicated region fallthrough
CT: control target
= control target key end

     0   :  { %6 = vsyncpa [#allocation3], 0  ;;  %s569_s0 = inlined_call_operand.hbm [shape: f32[2,16,256], index: 0, kind: input, shape index: {}]   ;;  %s570_s1 = inlined_call_operand.vmem [shape: f32[16,2], index: 1, kind: output, shape index: {}]  }
   0x1   :  { %8 = vsyncpa [#allocation3 + $0x1], 0  ;;  %s468_s6 = smov 0   ;;  %s470_s7 = smov 0  }
   0x2   :  { %s472_s8 = smov 0   ;;  %s474_s9 = smov 0  }
   0x3   :  { %s476_s10 = smov 0   ;;  %s478_s11 = smov 0  }
   0x4 LB: > { %s301_s12 = sadd.s32 4294967295, %s451_s11   ;;  %s26_s13 = sadd.s32 1, %s447_s10  ;;  %s451_s11 = sphi %s478_s11, %s14_s11   ;;  %s447_s10 = sphi %s476_s10, %s578_s10   ;;  %s443_s9 = sphi %s474_s9, %s577_s9   ;;  %s439_s8 = sphi %s472_s8, %s576_s8   ;;  %s435_s7 = sphi %s470_s7, %s575_s7   ;;  %s431_s6 = sphi %s468_s6, %s574_s6  }
   0x5   : > { %p28_p0 = scmp.ge.s32.totalorder %s26_s13, 2  ;;  %s35_s14 = sadd.s32 1, %s439_s8 }
   0x6   : > { %p42_p1 = scmp.ne.s32.totalorder %s439_s8, %s435_s7  ;;  %p43_p2 = scmp.eq.s32.totalorder %s451_s11, 0 }
   0x7   : > { %s580_s13 = smov (%p28_p0, %s26_s13), 0  ;;  %p48_p4 = scmp.ne.s32.totalorder %s435_s7, %s431_s6 }
   0x8   : > { %p504_p3 = por %p43_p2, %p42_p1  ;;  %s30_s16 = ssub.s32 %s447_s10, %s580_s13 }
   0x9   : > { %p49_p5 = scmp.eq.s32.totalorder %s301_s12, 0  ;;  %p33_p6 = scmp.eq.s32.totalorder %s30_s16, 0 }
   0xa   : > { %p320_p8 = scmp.lt.s32.totalorder %s451_s11, 2  ;;  %s98_s19 = sand.u32 1, %s439_s8  }
   0xb   : > { %p511_p7 = por %p49_p5, %p48_p4  ;;  %s313_s20 = sshll.u32 %s447_s10, 8 }
   0xc   : > { %s517_s18 = scalar_select %p33_p6, %s439_s8, %s35_s14  }
   0xd   : > { %s305_s21 = sshll.u32 %s98_s19, 5  ;;  %s110_s24 = scalar_lea.hbm %s569_s0, %s313_s20 }
   0xe   : > { %s102_s25 = scalar_lea.vmem [#allocation2], %s305_s21  ;;  %p526_p9 = pnand %p320_p8, %p504_p3 }
   0xf   : > { %s111_s26 = sshll.u32 %s102_s25, 4  ;;  %p308_p10 = scmp.ge.s32.totalorder %s451_s11, 1  ;;  %s112_s26 = int_to_ptr.vmem [resolvable:$true] %s111_s26 }
  0x10   : > { %s99_s28 = scalar_lea.sflag [#allocation3], %s98_s19  ;;  %p375_p11 = pneg %p526_p9 }
  0x11   : > { %s386_s29 = scalar_lea.vmem %s112_s26, 512  ;;  %s453_s30 = smov [#allocation2]  }
  0x12   : > { %p387_p12 = scmp.ne.s32.totalorder %s112_s26, %s386_s29  ;;  %s391_s2 = sshll.u32 %s453_s30, 4  ;;  %s392_s2 = int_to_ptr.vmem [resolvable:$false] %s391_s2 }
  0x13   : > { %s393_s3 = scalar_lea.vmem %s392_s2, 1024  ;;  %p394_p1 = scmp.lt.s32.totalorder %s112_s26, %s392_s2 }
  0x14   : > { %p389_p13 = pnand %p387_p12, %p375_p11  ;;  %p395_p2 = scmp.lt.s32.totalorder %s393_s3, %s386_s29 }
  0x16   : > { %p390_p0 = pneg %p389_p13  ;;  %p396_p3 = por %p395_p2, %p394_p1 }
  0x18   : > { %p397_p4 = pnand %p396_p3, %p390_p0 }
  0x1a   : > { %400 = shalt.err (!%p397_p4)
}
  0x1b   : > { %s454_s4 = smov 512   ;;  %s455_s5 = smov 256  }
  0x1c   : > { %s456_s6 = smov 16   ;;  %p119_p5 = scmp.lt.s32.totalorder %s451_s11, 3 }
  0x1d   : > { %319 = dma.hbm_to_vmem [thread:$0]  (!%p526_p9), %s110_s24, 512, %s112_s26, %s99_s28, %s454_s4, %s455_s5, %s456_s6  }
  0x1e   : > { %p120_p6 = pnand %p308_p10, %p119_p5 }
  0x1f   : > { %s125_s12 = sand.u32 (!%p120_p6), 1, %s435_s7  }
  0x20   : > { %123 = sbr.rel (%p120_p6) target bundleno = 324 (0x144), region = 24  ;;  %s309_s14 = sshll.u32 (!%p120_p6), %s125_s12, 5 }
  0x21   : > { %s126_s15 = scalar_lea.sflag (!%p120_p6), [#allocation3], %s125_s12  ;;  %s129_s16 = scalar_lea.vmem (!%p120_p6), [#allocation2], %s309_s14 }
  0x25   : > { %426 = dma.done.wait (%p511_p7), %s126_s15, 512  }
  0x26   : > { %428 = vsyncadd (%p511_p7), %s126_s15, 4294966784  ;;  %v158_v0 = vld [vmem:[%s129_s16] sm:$0xff]  ;;  %v159_v1 = vld [vmem:[%s129_s16 + $0x8] sm:$0xff]  ;;  %p148_p8 = scmp.lt.s32.totalorder %s443_s9, 1  ;;  %vm156_vm0 = vcmask 15360   ;;  %v457_v6 = vmov 0.0   ;;  %v171_v7 = vlaneseq }
  0x27   : > { %v160_v2 = vld [vmem:[%s129_s16 + $0x10] sm:$0xff]  ;;  %v163_v3 = vadd.f32 %v159_v1, %v158_v0  ;;  %v161_v4 = vld [vmem:[%s129_s16 + $0x18] sm:$0xff]  ;;  %vm181_vm1 = vcmask 1041409  }
  0x28   : > { %v166_v5 = vadd.f32 %v161_v4, %v160_v2  ;;  %s582_s9 = smov (!%p148_p8, %s443_s9), 1  ;;  %v172_v8 = vand.u32 127, %v171_v7  ;;  %v174_v9 = vshrl.u32 %v171_v7, 7 }
  0x29   : > { %164 = vadd.xlane.f32.xlu0 %v163_v3  ;;  %s310_s19 = sshll.u32 %s582_s9, 3 }
  0x2a   : > { %s151_s22 = scalar_lea.vmem %s570_s1, %s310_s19  ;;  %v175_v11 = vsub.s32 %v172_v8, %v174_v9 }
  0x2b   : > { %157 = vst.msk [vmem:[%s151_s22] sm:$0xff] %vm156_vm0, %v457_v6 }
  0x2d   : > { %167 = vadd.xlane.f32.xlu0 %v166_v5 }
  0x32   : > { %v162_v16 = vld [vmem:[%s151_s22] sm:$0xff] }
  0xb2   : > { %v165_v10 = vpop.xlane.xlu0 %164 }
  0xb3   : > { %v176_v13 = vrot.slane %v165_v10, %v175_v11 }
  0xb6   : > { %v168_v12 = vpop.xlane.xlu0 %167 }
  0xb7   : > { %v180_v14 = vrot.slane %v168_v12, %v175_v11 }
  0xb9   : > { %v182_v15 = vsel %vm181_vm1, %v180_v14, %v176_v13 }
  0xba   : > { %184 = vxpose.xlu1.b32.start.end [1/1] (short) (narrow) %v182_v15, 8 }
 0x136   : > { %v200_v17 = vpop.trf.xlu1 }
 0x137   : > { %v216_v18 = vadd.f32 %v200_v17, %v162_v16 }
 0x139   : > { %218 = vst.msk [vmem:[%s151_s22] sm:$0xff] %vm156_vm0, %v216_v18 }
 0x140   : > { %v222_v19 = vld [vmem:[%s151_s22] sm:$0xff] }
 0x141   : > { %v223_v20 = vmul.f32 0.00390625, %v222_v19 }
 0x143   : > { %224 = vst.msk [vmem:[%s151_s22] sm:$0xff] %vm156_vm0, %v223_v20 }
 0x144 PF: > { %s14_s11 = sadd.s32 1, %s451_s11   ;;  %s574_s6 = smov %s435_s7 }
 0x145   : > { %p11_p7 = scmp.ge.s32.totalorder %s14_s11, 4   ;;  %s575_s7 = smov %s439_s8 }
 0x146   : > { %s576_s8 = smov %s517_s18  ;;  %s577_s9 = smov %s447_s10 }
 0x147   : > { %s578_s10 = smov %s580_s13  ;;  %13 = sbr.rel (!%p11_p7) target bundleno = 4 (0x4), region = 72 }
 0x14c   :  { %244 = vsyncpa [#allocation3], 1 }
 0x14d   :  { %246 = vsyncpa [#allocation3 + $0x1], 1 }

</bundles_post_ra>
